<compile_context>
chip_gen: v5e
topology: v5e:2x2
jax: 0.10.0
libtpu: 0.0.40
codegen_flags: <defaults>
</compile_context>

<pallas_src>
import math

import jax
import jax.numpy as jnp
from jax.experimental import pallas as pl
from jax.experimental.pallas import tpu as pltpu

# ---- module hyper-parameters (deterministic, set in-script) ----
N_SAMPLES = 128
MN = 0.0
MX = 1.0
SCALE = MX - MN
EPSILON = 1e-8          # Normal-scale epsilon from Window.__init__
MAX_NORM_EPS = 1e-8     # epsilon used by max_norm's denominator

_SQRT_2PI = math.sqrt(2.0 * math.pi)
_INV_SQRT_2PI = 1.0 / _SQRT_2PI


def _round_up(x, m):
    return ((x + m - 1) // m) * m


def _num_tensorcores():
    """Best-effort TensorCores-per-chip query (2 on v7x/v4/v5p, 1 on v5e/v6e)."""
    try:
        info = pltpu.get_tpu_info()
        for attr in ("num_cores", "num_tensorcores", "tensorcores_per_chip",
                     "cores_per_chip"):
            n = getattr(info, attr, None)
            if n:
                return max(1, int(n))
    except Exception:
        pass
    try:
        kind = jax.devices()[0].device_kind.lower()
        if ("v7" in kind) or ("v4" in kind) or ("v5p" in kind):
            return 2
    except Exception:
        pass
    return 1


def _window_kernel(rng_ref, ms_ref, out_ref):
    # rng_ref: (1, N); ms_ref: (TR, 2) packed [mean, std]; out_ref: (TR, N)
    ms = ms_ref[...]
    means = ms[:, 0:1]                                    # (TR, 1)
    stds = ms[:, 1:2]                                     # (TR, 1)

    mu = MN + means * SCALE                               # (TR, 1)
    sd = EPSILON + stds                                   # (TR, 1), > 0 by Normal semantics
    inv_sd = 1.0 / sd                                     # per-row reciprocal (narrow column)
    neg_half_inv_var = (-0.5) * inv_sd * inv_sd           # (TR, 1)

    t = rng_ref[...]                                      # (1, N) precomputed linspace
    d = t - mu                                            # (TR, N)
    e = jnp.exp((d * d) * neg_half_inv_var)               # unnormalized gaussian, (TR, N)

    # max_norm with the positive per-row constant c = 1/(sd*sqrt(2*pi)) cancelled:
    #   c*e / (max|c*e| + eps) == e / (max(e) + eps*sd*sqrt(2*pi))   (e > 0, no abs needed)
    mx = jnp.max(e, axis=-1, keepdims=True)               # (TR, 1)
    inv_den = 1.0 / (mx + (MAX_NORM_EPS * _SQRT_2PI) * sd)
    out_ref[...] = (e * inv_den).astype(out_ref.dtype)


def window(means, stds, *, row_tile=4096, out_dtype=jnp.float32):
    """means, stds: (B, E, 1) -> (B, E, N_SAMPLES)."""
    B, E, _ = means.shape
    R = B * E
    num_tc = _num_tensorcores()

    # Row tile: as big as row_tile (default 4096 rows = 2 MiB f32 output per
    # step), aligned to 8 sublanes.  On multi-TC chips keep the grid long
    # enough (and a multiple of num_tc) so the "parallel" axis shards evenly;
    # on single-TC chips use one bigger tile instead.
    rt = min(int(row_tile), 8192, _round_up(R, 8))
    if num_tc > 1:
        rt = min(rt, _round_up(pl.cdiv(R, num_tc), 8))
    rt = max(8, (rt // 8) * 8)

    grid = pl.cdiv(R, rt)
    if num_tc > 1:
        grid = _round_up(grid, num_tc)
    R_pad = grid * rt

    # Pack means and stds into one (R_pad, 2) array: halves input buffers/DMAs
    # (a (rt, 1) and a (rt, 2) block both lane-pad to rt x 128 in VMEM).
    means2 = means.reshape(R, 1).astype(jnp.float32)
    stds2 = stds.reshape(R, 1).astype(jnp.float32)
    ms = jnp.concatenate([means2, stds2], axis=1)         # (R, 2)
    if R_pad != R:
        ms = jnp.pad(ms, ((0, R_pad - R), (0, 0)), constant_values=1.0)

    # Precomputed linspace row, shared by every grid step.
    rng = jnp.linspace(0.0, 1.0, N_SAMPLES, dtype=jnp.float32).reshape(1, N_SAMPLES)

    # Size the scoped-VMEM limit to the real (double-buffered) working set:
    # output tile + lane-padded packed input tile + tiny rng row.
    out_bytes = jnp.dtype(out_dtype).itemsize
    needed = (2 * rt * N_SAMPLES * out_bytes     # output, double-buffered
              + 2 * rt * 128 * 4                 # (rt, 2) input, lane-padded, double-buffered
              + 2 * 8 * 128 * 4)                 # rng row
    vmem_limit = int(min(max(2 * needed, 32 << 20), 56 << 20))

    out = pl.pallas_call(
        _window_kernel,
        out_shape=jax.ShapeDtypeStruct((R_pad, N_SAMPLES), out_dtype),
        grid_spec=pltpu.PrefetchScalarGridSpec(
            num_scalar_prefetch=0,
            grid=(grid,),
            in_specs=[
                pl.BlockSpec((1, N_SAMPLES), lambda i: (0, 0)),  # constant rng row
                pl.BlockSpec((rt, 2), lambda i: (i, 0)),         # packed [mean, std]
            ],
            out_specs=pl.BlockSpec((rt, N_SAMPLES), lambda i: (i, 0)),
        ),
        compiler_params=pltpu.CompilerParams(
            dimension_semantics=("parallel",),
            vmem_limit_bytes=vmem_limit,
        ),
    )(rng, ms)

    return out[:R].reshape(B, E, N_SAMPLES)


def window_ref(means, stds):
    """Pure-JAX reference for correctness checking (mirrors the PyTorch module)."""
    mu = MN + means * SCALE                               # (B, E, 1)
    sd = EPSILON + stds
    rng = jnp.linspace(0.0, 1.0, N_SAMPLES)[None, None, :]
    pdf = jnp.exp(-0.5 * ((rng - mu) / sd) ** 2) * (_INV_SQRT_2PI / sd)
    mx = jnp.max(jnp.abs(pdf), axis=-1, keepdims=True)
    return pdf / (mx + MAX_NORM_EPS)


if __name__ == "__main__":
    key = jax.random.PRNGKey(0)
    k_m, k_s = jax.random.split(key)

    B, E = 2, 8  # batch, number of events  (R = 16 rows)
    means = jax.random.uniform(k_m, (B, E, 1), dtype=jnp.float32)             # in [0, 1)
    stds = jax.random.uniform(k_s, (B, E, 1), dtype=jnp.float32) * 0.2 + 0.01  # > 0

    out = window(means, stds)
    out = jax.block_until_ready(out)

    ref = window_ref(means, stds)
    assert out.shape == (B, E, N_SAMPLES)
    assert jnp.allclose(out, ref, atol=2e-5, rtol=1e-4), "mismatch vs reference"

    print("KERNEL_OK")
</pallas_src>

<mosaic_0001>
module attributes {stable_mosaic.version = 11 : i64} {
  func.func @_window_kernel(%arg0: i32, %arg1: memref<1x128xf32, #tpu.memory_space<vmem>>, %arg2: memref<16x2xf32, #tpu.memory_space<vmem>>, %arg3: memref<16x128xf32, #tpu.memory_space<vmem>>) attributes {dimension_semantics = [#tpu.dimension_semantics<parallel>], iteration_bounds = array<i64: 1>, scalar_prefetch = 0 : i64, scratch_operands = 0 : i64, tpu.core_type = #tpu.core_type<tc>, window_params = [{pipeline_mode = #tpu.pipeline_mode<synchronous>, transform_indices = @transform_0, window_bounds = array<i64: 1, 128>}, {transform_indices = @transform_1, window_bounds = array<i64: 16, 2>}, {transform_indices = @transform_2, window_bounds = array<i64: 16, 128>}]} {
    %c0 = arith.constant 0 : index
    %c0_0 = arith.constant 0 : index
    %0 = vector.load %arg2[%c0, %c0_0] : memref<16x2xf32, #tpu.memory_space<vmem>>, vector<16x2xf32>
    %1 = vector.extract_strided_slice %0 {offsets = [0, 0], sizes = [16, 1], strides = [1, 1]} : vector<16x2xf32> to vector<16x1xf32>
    %2 = vector.extract_strided_slice %0 {offsets = [0, 1], sizes = [16, 1], strides = [1, 1]} : vector<16x2xf32> to vector<16x1xf32>
    %cst = arith.constant 1.000000e+00 : f32
    %3 = vector.broadcast %cst : f32 to vector<16x1xf32>
    %4 = arith.mulf %1, %3 : vector<16x1xf32>
    %cst_1 = arith.constant 0.000000e+00 : f32
    %5 = vector.broadcast %cst_1 : f32 to vector<16x1xf32>
    %6 = arith.addf %5, %4 : vector<16x1xf32>
    %cst_2 = arith.constant 9.99999993E-9 : f32
    %7 = vector.broadcast %cst_2 : f32 to vector<16x1xf32>
    %8 = arith.addf %7, %2 : vector<16x1xf32>
    %cst_3 = arith.constant 1.000000e+00 : f32
    %9 = vector.broadcast %cst_3 : f32 to vector<16x1xf32>
    %10 = arith.divf %9, %8 : vector<16x1xf32>
    %cst_4 = arith.constant -5.000000e-01 : f32
    %11 = vector.broadcast %cst_4 : f32 to vector<16x1xf32>
    %12 = arith.mulf %11, %10 : vector<16x1xf32>
    %13 = arith.mulf %12, %10 : vector<16x1xf32>
    %c0_5 = arith.constant 0 : index
    %c0_6 = arith.constant 0 : index
    %14 = vector.load %arg1[%c0_5, %c0_6] : memref<1x128xf32, #tpu.memory_space<vmem>>, vector<1x128xf32>
    %15 = vector.broadcast %14 : vector<1x128xf32> to vector<16x128xf32>
    %16 = vector.broadcast %6 : vector<16x1xf32> to vector<16x128xf32>
    %17 = arith.subf %15, %16 : vector<16x128xf32>
    %18 = arith.mulf %17, %17 : vector<16x128xf32>
    %19 = vector.broadcast %13 : vector<16x1xf32> to vector<16x128xf32>
    %20 = arith.mulf %18, %19 : vector<16x128xf32>
    %21 = math.exp %20 : vector<16x128xf32>
    %cst_7 = arith.constant dense<0xFF800000> : vector<16xf32>
    %22 = vector.multi_reduction <maximumf>, %21, %cst_7 [1] : vector<16x128xf32> to vector<16xf32>
    %23 = vector.shape_cast %22 : vector<16xf32> to vector<16x1xf32>
    %cst_8 = arith.constant 2.50662833E-8 : f32
    %24 = vector.broadcast %cst_8 : f32 to vector<16x1xf32>
    %25 = arith.mulf %24, %8 : vector<16x1xf32>
    %26 = arith.addf %23, %25 : vector<16x1xf32>
    %cst_9 = arith.constant 1.000000e+00 : f32
    %27 = vector.broadcast %cst_9 : f32 to vector<16x1xf32>
    %28 = arith.divf %27, %26 : vector<16x1xf32>
    %29 = vector.broadcast %28 : vector<16x1xf32> to vector<16x128xf32>
    %30 = arith.mulf %21, %29 : vector<16x128xf32>
    %c0_10 = arith.constant 0 : index
    %c0_11 = arith.constant 0 : index
    %31 = vector.load %arg3[%c0_10, %c0_11] : memref<16x128xf32, #tpu.memory_space<vmem>>, vector<16x128xf32>
    tpu.vector_store %arg3[%c0_10, %c0_11], %30 {strides = array<i32>} : memref<16x128xf32, #tpu.memory_space<vmem>>, vector<16x128xf32>,
    return
  }
  func.func @transform_0(%arg0: i32) -> (i32, i32) {
    %c0_i32 = arith.constant 0 : i32
    %c0_i32_0 = arith.constant 0 : i32
    %c0_i32_1 = arith.constant 0 : i32
    return %c0_i32, %c0_i32_0 : i32, i32
  }
  func.func @transform_1(%arg0: i32) -> (i32, i32) {
    %c0_i32 = arith.constant 0 : i32
    %c0_i32_0 = arith.constant 0 : i32
    return %arg0, %c0_i32 : i32, i32
  }
  func.func @transform_2(%arg0: i32) -> (i32, i32) {
    %c0_i32 = arith.constant 0 : i32
    %c0_i32_0 = arith.constant 0 : i32
    return %arg0, %c0_i32 : i32, i32
  }
}

</mosaic_0001>

<bundles_post_ra>
// kernel: tpu_custom_call.1
= control target key start
LH: loop header
LB: loop body
LE: loop exit
PB: predicated region body
PF: predicated region fallthrough
CT: control target
= control target key end

     0   :  { %v203_v2 = vmov 0   ;;  %v204_v5 = vmov 1   ;;  %s243_s0 = inlined_call_operand.vmem [shape: f32[1,128], index: 0, kind: input, shape index: {}]   ;;  %s244_s1 = inlined_call_operand.vmem [shape: f32[16,2], index: 1, kind: input, shape index: {}]   ;;  %s245_s2 = inlined_call_operand.hbm [shape: f32[16,128], index: 2, kind: output, shape index: {}]  }
   0x1   :  { %v12_v0 = vld [vmem:[%s244_s1] sm:$0xff]  ;;  %v13_v1 = vld [vmem:[%s244_s1 + $0x8] sm:$0xff]  ;;  %161 = vset.pattern.permute.xlu0 %v203_v2  ;;  %162 = vset.pattern.permute.xlu1 %v204_v5 }
   0x2   :  { %v16_v3 = vadd.f32 1e-08, %v12_v0  ;;  %v229_v4 = vadd.f32 1e-08, %v13_v1  ;;  %58 = vperm.xlu0 %161, %v12_v0  }
   0x3   :  { %7 = vsyncpa [#allocation3], 0  ;;  %v164_v30 = vld [vmem:[%s243_s0] ss:$0 sm:$0xff]  ;;  %s205_s0 = smov [#allocation2]   ;;  %s144_s17 = sshll.u32 %s245_s2, 4  ;;  %s145_s17 = int_to_ptr.hbm [resolvable:$true] %s144_s17 }
   0x4   :  { %165 = vrcp.f32 %v16_v3  ;;  %v29_v9 = vand.u32 2147483648, %v16_v3  ;;  %vm23_vm0 = vweird.f32 %v16_v3  ;;  %v27_v12 = vand.u32 2147483647, %v16_v3  ;;  %s142_s14 = sshll.u32 %s205_s0, 4  ;;  %s206_s18 = smov 128   ;;  %s143_s14 = int_to_ptr.vmem [resolvable:$true] %s142_s14 }
   0x5   :  { %167 = vrcp.f32 %v229_v4  ;;  %vm38_vm2 = vweird.f32 %v229_v4  ;;  %v44_v14 = vand.u32 2147483648, %v229_v4  ;;  %v42_v16 = vand.u32 2147483647, %v229_v4  ;;  %s207_s19 = smov 8  }
   0x6   :  { %v30_v17 = vor.u32 1.1754944e-38, %v29_v9  ;;  %vm28_vm5 = vcmp.eq.f32.partialorder %v27_v12, 8.507059e+37  ;;  %v90_v45 = vmul.f32 2.5066283e-08, %v16_v3  ;;  %v91_v48 = vmul.f32 2.5066283e-08, %v229_v4 }
   0x7   :  { %v45_v21 = vor.u32 1.1754944e-38, %v44_v14  ;;  %vm43_vm7 = vcmp.eq.f32.partialorder %v42_v16, 8.507059e+37 }
   0xa   :  { %v166_v6 = vpop.eup %165  ;;  %63 = vperm.xlu0 %161, %v13_v1  }
   0xb   :  { %v168_v7 = vpop.eup %167  ;;  %v19_v8 = vmul.f32 %v166_v6, %v16_v3  ;;  %vm24_vm1 = vweird.f32 %v166_v6 }
   0xc   :  { %v34_v10 = vmul.f32 %v168_v7, %v229_v4  ;;  %vm39_vm3 = vweird.f32 %v168_v7  ;;  %vm25_vm4 = vmor %vm23_vm0, %vm24_vm1 }
   0xd   :  { %v20_v11 = vsub.f32 1.0, %v19_v8  ;;  %vm40_vm6 = vmor %vm38_vm2, %vm39_vm3 }
   0xe   :  { %v35_v13 = vsub.f32 1.0, %v34_v10 }
   0xf   :  { %v21_v15 = vmul.f32 %v166_v6, %v20_v11 }
  0x10   :  { %v36_v18 = vmul.f32 %v168_v7, %v35_v13 }
  0x11   :  { %v22_v19 = vadd.f32 %v166_v6, %v21_v15 }
  0x12   :  { %v37_v20 = vadd.f32 %v168_v7, %v36_v18  ;;  %163 = vset.pattern.permute.xlu0 %v204_v5 }
  0x13   :  { %v26_v22 = vsel %vm25_vm4, %v166_v6, %v22_v19 }
  0x14   :  { %v31_v23 = vsel %vm28_vm5, %v30_v17, %v26_v22  ;;  %v41_v24 = vsel %vm40_vm6, %v168_v7, %v37_v20 }
  0x15   :  { %v48_v25 = vmul.f32 -0.5, %v31_v23  ;;  %v46_v26 = vsel %vm43_vm7, %v45_v21, %v41_v24 }
  0x16   :  { %v49_v28 = vmul.f32 -0.5, %v46_v26 }
  0x17   :  { %v50_v27 = vmul.f32 %v48_v25, %v31_v23 }
  0x18   :  { %v51_v29 = vmul.f32 %v49_v28, %v46_v26 }
  0x19   :  { %72 = vperm.xlu1 %162, %v50_v27  }
  0x21   :  { %77 = vperm.xlu1 %162, %v51_v29  }
  0x74   :  { %v59_v31 = vpop.permute.xlu0 %58 }
  0x75   :  { %v66_v32 = vsub.f32 %v164_v30, %v59_v31 }
  0x77   :  { %v68_v33 = vmul.f32 %v66_v32, %v66_v32 }
  0x7c   :  { %v64_v34 = vpop.permute.xlu0 %63 }
  0x7d   :  { %v67_v37 = vsub.f32 %v164_v30, %v64_v34 }
  0x7f   :  { %v69_v39 = vmul.f32 %v67_v37, %v67_v37 }
  0x8b   :  { %v73_v35 = vpop.permute.xlu1 %72 }
  0x8c   :  { %v80_v36 = vmul.f32 %v73_v35, %v68_v33 }
  0x8e   :  { %v82_v38 = vmul.f32 1.442695, %v80_v36 }
  0x90   :  { %169 = vpow2.f32 %v82_v38 }
  0x93   :  { %v78_v40 = vpop.permute.xlu1 %77 }
  0x94   :  { %v81_v41 = vmul.f32 %v78_v40, %v69_v39 }
  0x96   :  { %v170_v42 = vpop.eup %169  ;;  %v84_v43 = vmul.f32 1.442695, %v81_v41 }
  0x97   :  { %86 = vmax.xlane.f32.xlu2 %v170_v42 }
  0x98   :  { %171 = vpow2.f32 %v84_v43 }
  0x9e   :  { %v172_v44 = vpop.eup %171 }
  0x9f   :  { %88 = vmax.xlane.f32.xlu2 %v172_v44 }
 0x10a   :  { %v87_v46 = vpop.xlane.xlu2 %86 }
 0x10b   :  { %v92_v47 = vadd.f32 %v90_v45, %v87_v46 }
 0x10d   :  { %173 = vrcp.f32 %v92_v47  ;;  %v105_v54 = vand.u32 2147483648, %v92_v47  ;;  %v103_v56 = vand.u32 2147483647, %v92_v47  ;;  %vm99_vm9 = vweird.f32 %v92_v47 }
 0x10f   :  { %v106_v59 = vor.u32 1.1754944e-38, %v105_v54  ;;  %vm104_vm11 = vcmp.eq.f32.partialorder %v103_v56, 8.507059e+37 }
 0x112   :  { %v89_v49 = vpop.xlane.xlu2 %88 }
 0x113   :  { %v174_v50 = vpop.eup %173  ;;  %v93_v51 = vadd.f32 %v91_v48, %v89_v49 }
 0x114   :  { %v95_v52 = vmul.f32 %v174_v50, %v92_v47  ;;  %vm100_vm8 = vweird.f32 %v174_v50 }
 0x115   :  { %175 = vrcp.f32 %v93_v51  ;;  %vm101_vm10 = vmor %vm99_vm9, %vm100_vm8  ;;  %v120_v0 = vand.u32 2147483648, %v93_v51  ;;  %v118_v2 = vand.u32 2147483647, %v93_v51  ;;  %vm114_vm13 = vweird.f32 %v93_v51 }
 0x116   :  { %v96_v53 = vsub.f32 1.0, %v95_v52 }
 0x117   :  { %v121_v4 = vor.u32 1.1754944e-38, %v120_v0  ;;  %vm119_vm15 = vcmp.eq.f32.partialorder %v118_v2, 8.507059e+37 }
 0x118   :  { %v97_v55 = vmul.f32 %v174_v50, %v96_v53 }
 0x11a   :  { %v98_v57 = vadd.f32 %v174_v50, %v97_v55 }
 0x11b   :  { %v176_v58 = vpop.eup %175 }
 0x11c   :  { %v102_v60 = vsel %vm101_vm10, %v174_v50, %v98_v57  ;;  %v110_v61 = vmul.f32 %v176_v58, %v93_v51  ;;  %vm115_vm12 = vweird.f32 %v176_v58 }
 0x11d   :  { %v107_v62 = vsel %vm104_vm11, %v106_v59, %v102_v60  ;;  %vm116_vm14 = vmor %vm114_vm13, %vm115_vm12 }
 0x11e   :  { %126 = vperm.xlu0 %163, %v107_v62   ;;  %v111_v63 = vsub.f32 1.0, %v110_v61 }
 0x120   :  { %v112_v1 = vmul.f32 %v176_v58, %v111_v63 }
 0x122   :  { %v113_v3 = vadd.f32 %v176_v58, %v112_v1 }
 0x124   :  { %v117_v5 = vsel %vm116_vm14, %v176_v58, %v113_v3 }
 0x125   :  { %v122_v6 = vsel %vm119_vm15, %v121_v4, %v117_v5 }
 0x126   :  { %131 = vperm.xlu1 %162, %v122_v6  }
 0x190   :  { %v127_v7 = vpop.permute.xlu0 %126 }
 0x191   :  { %v134_v8 = vmul.f32 %v170_v42, %v127_v7 }
 0x193   :  { %136 = vst [vmem:[#allocation2] sm:$0xff] %v134_v8 }
 0x198   :  { %v132_v9 = vpop.permute.xlu1 %131 }
 0x199   :  { %v135_v10 = vmul.f32 %v172_v44, %v132_v9 }
 0x19b   :  { %137 = vst [vmem:[#allocation2 + $0x8] sm:$0xff] %v135_v10 }
 0x19c   :  { %150 = dma.vmem_to_hbm [thread:$0]  %s143_s14, 256, %s145_s17, [#allocation3], %s206_s18, %s206_s18, %s207_s19  }
 0x19d   :  { %201 = dma.done.wait [#allocation3], 256  }
 0x19e   :  { %202 = vsyncadd [#allocation3], 4294967040 }
 0x19f   :  { %155 = vsyncpa [#allocation3], 1 }

</bundles_post_ra>
